<compile_context>
chip_gen: v5e
topology: v5e:2x2
jax: 0.10.0
libtpu: 0.0.40
codegen_flags: <defaults>
</compile_context>

<pallas_src>
import jax
import jax.numpy as jnp
from jax import lax
from jax.experimental import pallas as pl
from jax.experimental.pallas import tpu as pltpu


# ----------------------------------------------------------------------------
# Kernels
# ----------------------------------------------------------------------------

def _expert_fused_kernel(x_ref, w1_ref, b1_ref, w2_ref, b2_ref, o_ref):
    """Whole FFN for one token tile; both weights resident in VMEM."""
    h = jnp.dot(x_ref[...], w1_ref[...], preferred_element_type=jnp.float32)
    h = h + b1_ref[...].astype(jnp.float32)
    h = h * jax.nn.sigmoid(h)                                   # SiLU (EUP)
    y = jnp.dot(h.astype(w2_ref.dtype), w2_ref[...],
                preferred_element_type=jnp.float32)
    y = y + b2_ref[...].astype(jnp.float32)
    o_ref[...] = y.astype(o_ref.dtype)


def _reduce_step(x_ref, w1_ref, b1_ref, w2_ref, b2_ref, acc_ref):
    """One hidden-dim tile of the reduction; acc_ref is an f32 (tm, D) block."""
    @pl.when(pl.program_id(1) == 0)
    def _init():
        # Fold b2 into the accumulator init (saves a finalize VPU pass).
        acc_ref[...] = jnp.broadcast_to(
            b2_ref[...].astype(jnp.float32), acc_ref.shape)

    h = jnp.dot(x_ref[...], w1_ref[...], preferred_element_type=jnp.float32)
    h = h + b1_ref[...].astype(jnp.float32)     # each h column biased once
    h = h * jax.nn.sigmoid(h)                   # SiLU
    acc_ref[...] += jnp.dot(h.astype(w2_ref.dtype), w2_ref[...],
                            preferred_element_type=jnp.float32)


def _expert_reduce_inplace_kernel(x_ref, w1_ref, b1_ref, w2_ref, b2_ref,
                                  o_ref):
    """Reduction path, f32 output: accumulate directly into o_ref."""
    _reduce_step(x_ref, w1_ref, b1_ref, w2_ref, b2_ref, o_ref)


def _expert_reduce_scratch_kernel(x_ref, w1_ref, b1_ref, w2_ref, b2_ref,
                                  o_ref, acc_ref):
    """Reduction path, non-f32 output: f32 scratch accumulator + final cast."""
    _reduce_step(x_ref, w1_ref, b1_ref, w2_ref, b2_ref, acc_ref)

    @pl.when(pl.program_id(1) == pl.num_programs(1) - 1)
    def _store():
        o_ref[...] = acc_ref[...].astype(o_ref.dtype)


# ----------------------------------------------------------------------------
# VMEM-aware configuration
# ----------------------------------------------------------------------------

def _vmem_budget():
    """~75% of this generation's per-core VMEM (v5e/v6e: 128 MiB, v7x: 64 MiB)."""
    cap = 64 * 1024 * 1024  # conservative fallback (v7x per-TC)
    try:
        info = pltpu.get_tpu_info()
        cap = int(getattr(info, "vmem_capacity_bytes", cap) or cap)
    except Exception:
        pass
    return (cap * 3) // 4


def _tile_candidates(dim, align, cap):
    """Divisors of `dim` that are multiples of `align` (or `dim` itself),
    descending, capped at `cap`."""
    cap = min(cap, dim)
    cands = [v for v in range(cap, 0, -1)
             if dim % v == 0 and (v % align == 0 or v == dim)]
    return cands or [dim]


def _select_config(T, D, H, x_bytes, w_bytes, out_bytes, use_scratch, budget,
                   mode=None, tm=None, th=None):
    """Returns (fused, tm, th)."""
    f32b = 4
    sub_align = {4: 8, 2: 16, 1: 32}.get(x_bytes, 8)   # dtype-aware sublanes
    tm_cands = _tile_candidates(T, sub_align, 1024)
    th_cands = _tile_candidates(H, 128, 4096)          # lane-dense hidden tiles

    def fused_ws(t):                                   # fused working set
        return (2 * 2 * D * H * w_bytes                # w1 + w2, double-buffered
                + 2 * t * D * (x_bytes + out_bytes)    # x / out tiles
                + t * (H + D) * f32b                   # live f32 intermediates
                + 2 * (H + D) * f32b)                  # biases

    def red_ws(t, hh):                                 # reduction working set
        return (2 * t * D * x_bytes
                + 2 * D * hh * w_bytes + 2 * hh * D * w_bytes
                + 2 * t * D * out_bytes
                + (t * D * f32b if use_scratch else 0)
                + t * hh * f32b
                + 2 * (hh + D) * f32b)

    def pick_largest(cands, fits, dim):
        ok = [c for c in cands if fits(c)]
        if not ok:
            return None
        best = ok[0]
        if dim // best < 2:             # prefer >= 2 tiles so both v7x TCs work
            for c in ok:
                if dim // c >= 2:
                    return c
        return best

    # --- fused path: both weights resident, no reduction axis -------------
    if mode != "reduce" and th is None:
        tm_f = tm if tm is not None else pick_largest(
            tm_cands, lambda t: fused_ws(t) <= budget, T)
        if tm_f is not None and (mode == "fused" or fused_ws(tm_f) <= budget):
            return True, tm_f, H

    # --- reduction path: tile H, accumulate across h steps ----------------
    th_floor = th if th is not None else next(
        (c for c in th_cands if c <= 512), th_cands[-1])
    if tm is not None:
        tm_r = tm
    else:
        tm_r = pick_largest(tm_cands,
                            lambda t: red_ws(t, th_floor) <= budget, T)
        if tm_r is None:
            tm_r = tm_cands[-1]
    if th is not None:
        th_r = th
    else:
        th_r = next((c for c in th_cands if red_ws(tm_r, c) <= budget),
                    th_cands[-1])
    return False, tm_r, th_r


# ----------------------------------------------------------------------------
# Wrapper
# ----------------------------------------------------------------------------

def expert_forward(x, w1, b1, w2, b2, *, tm=None, th=None, mode=None,
                   compute_dtype=None):
    """y = silu(x @ w1 + b1) @ w2 + b2.

    x: [..., D]; w1: [D, H]; b1: [H]; w2: [H, D]; b2: [D].
    Weights are [in_features, out_features] (transpose of nn.Linear.weight).
    compute_dtype=jnp.bfloat16 enables the bf16 MXU fast path for f32 inputs
    (f32 accumulation, output dtype unchanged).
    """
    D, H = w1.shape
    assert x.shape[-1] == D and w2.shape == (H, D)
    assert b1.shape == (H,) and b2.shape == (D,)

    orig_shape = x.shape
    out_dtype = x.dtype
    x2 = x.reshape(-1, D)
    T = x2.shape[0]

    if compute_dtype is not None:       # optional bf16 MXU path for f32 inputs
        x2 = x2.astype(compute_dtype)
        w1 = w1.astype(compute_dtype)
        w2 = w2.astype(compute_dtype)

    # Biases in f32 (they feed the f32 accumulator), as 2-D rows.
    b1_2d = b1.astype(jnp.float32).reshape(1, H)
    b2_2d = b2.astype(jnp.float32).reshape(1, D)

    x_bytes = x2.dtype.itemsize
    w_bytes = w1.dtype.itemsize
    out_bytes = jnp.dtype(out_dtype).itemsize
    use_scratch = jnp.dtype(out_dtype) != jnp.float32

    budget = _vmem_budget()
    fused, tm_sel, th_sel = _select_config(
        T, D, H, x_bytes, w_bytes, out_bytes, use_scratch, budget,
        mode=mode, tm=tm, th=th)
    assert T % tm_sel == 0 and H % th_sel == 0
    vmem_limit = int(budget)

    # Honest cost estimate: weights are re-read once per token tile on the
    # reduction path, once total on the fused path.
    w_reads = 1 if fused else (T // tm_sel)
    cost = pl.CostEstimate(
        flops=4 * T * D * H,                       # two matmuls: 2*T*D*H each
        transcendentals=T * H,                     # sigmoid
        bytes_accessed=int(T * D * x_bytes
                           + w_reads * (w1.size + w2.size) * w_bytes
                           + (H + D) * 4
                           + T * D * out_bytes),
    )

    if fused:
        grid = (T // tm_sel,)
        y = pl.pallas_call(
            _expert_fused_kernel,
            out_shape=jax.ShapeDtypeStruct((T, D), out_dtype),
            grid_spec=pltpu.PrefetchScalarGridSpec(
                num_scalar_prefetch=0,
                grid=grid,
                in_specs=[
                    pl.BlockSpec((tm_sel, D), lambda t: (t, 0)),   # x tile
                    pl.BlockSpec((D, H), lambda t: (0, 0)),        # w1 resident
                    pl.BlockSpec((1, H), lambda t: (0, 0)),        # b1
                    pl.BlockSpec((H, D), lambda t: (0, 0)),        # w2 resident
                    pl.BlockSpec((1, D), lambda t: (0, 0)),        # b2
                ],
                out_specs=pl.BlockSpec((tm_sel, D), lambda t: (t, 0)),
            ),
            compiler_params=pltpu.CompilerParams(
                dimension_semantics=("parallel",),
                vmem_limit_bytes=vmem_limit),
            cost_estimate=cost,
        )(x2, w1, b1_2d, w2, b2_2d)
    else:
        grid = (T // tm_sel, H // th_sel)
        in_specs = [
            pl.BlockSpec((tm_sel, D), lambda t, h: (t, 0)),   # x: h-invariant
            pl.BlockSpec((D, th_sel), lambda t, h: (0, h)),   # w1 tile
            pl.BlockSpec((1, th_sel), lambda t, h: (0, h)),   # b1 tile
            pl.BlockSpec((th_sel, D), lambda t, h: (h, 0)),   # w2 tile
            pl.BlockSpec((1, D), lambda t, h: (0, 0)),        # b2
        ]
        out_spec = pl.BlockSpec((tm_sel, D), lambda t, h: (t, 0))
        if use_scratch:
            kernel = _expert_reduce_scratch_kernel
            scratch = [pltpu.VMEM((tm_sel, D), jnp.float32)]
        else:                           # f32 output: accumulate into o_ref
            kernel = _expert_reduce_inplace_kernel
            scratch = []
        y = pl.pallas_call(
            kernel,
            out_shape=jax.ShapeDtypeStruct((T, D), out_dtype),
            grid_spec=pltpu.PrefetchScalarGridSpec(
                num_scalar_prefetch=0,
                grid=grid,
                in_specs=in_specs,
                out_specs=out_spec,
                scratch_shapes=scratch,
            ),
            compiler_params=pltpu.CompilerParams(
                dimension_semantics=("parallel", "arbitrary"),
                vmem_limit_bytes=vmem_limit),
            cost_estimate=cost,
        )(x2, w1, b1_2d, w2, b2_2d)

    return y.reshape(orig_shape[:-1] + (D,))


# ----------------------------------------------------------------------------
# Reference + self-test
# ----------------------------------------------------------------------------

def _reference(x, w1, b1, w2, b2):
    xf = x.astype(jnp.float32).reshape(-1, x.shape[-1])
    h = jnp.dot(xf, w1.astype(jnp.float32),
                precision=lax.Precision.HIGHEST) + b1.astype(jnp.float32)
    h = h * jax.nn.sigmoid(h)
    y = jnp.dot(h, w2.astype(jnp.float32),
                precision=lax.Precision.HIGHEST) + b2.astype(jnp.float32)
    return y.reshape(x.shape)


if __name__ == "__main__":
    dim, hidden_dim = 128, 512
    batch, seq = 2, 8
    key = jax.random.PRNGKey(0)
    kx, kw1, kb1, kw2, kb2 = jax.random.split(key, 5)

    x = jax.random.normal(kx, (batch, seq, dim), dtype=jnp.float32)
    # nn.Linear-style params, stored [in, out] (transpose of torch .weight).
    w1 = jax.random.uniform(kw1, (dim, hidden_dim), jnp.float32, -1., 1.) / jnp.sqrt(dim)
    b1 = jax.random.uniform(kb1, (hidden_dim,), jnp.float32, -0.5, 0.5)
    w2 = jax.random.uniform(kw2, (hidden_dim, dim), jnp.float32, -1., 1.) / jnp.sqrt(hidden_dim)
    b2 = jax.random.uniform(kb2, (dim,), jnp.float32, -0.5, 0.5)

    ref = _reference(x, w1, b1, w2, b2)

    # 1) Auto config: weights fit VMEM -> fused path, f32 compute.
    out = jax.block_until_ready(expert_forward(x, w1, b1, w2, b2))
    assert out.shape == x.shape
    assert jnp.allclose(out, ref, atol=2e-2, rtol=2e-2), "fused f32 mismatch"

    # 2) Forced reduction path (exercises accumulator / h tiling); f32 output
    #    -> accumulates directly into the output block (no scratch).
    out_r = jax.block_until_ready(
        expert_forward(x, w1, b1, w2, b2, mode="reduce", tm=8, th=128))
    assert jnp.allclose(out_r, ref, atol=2e-2, rtol=2e-2), "reduce f32 mismatch"

    # 3) bf16 MXU fast path for f32 inputs (f32 accumulation, f32 output).
    out_fast = jax.block_until_ready(
        expert_forward(x, w1, b1, w2, b2, compute_dtype=jnp.bfloat16))
    assert jnp.allclose(out_fast, ref, atol=8e-2, rtol=8e-2), \
        "bf16-compute mismatch"

    # 4) Native bf16 inputs/weights (bf16 output) on the reduction path
    #    -> f32 scratch-accumulator variant.
    out_bf = jax.block_until_ready(
        expert_forward(x.astype(jnp.bfloat16), w1.astype(jnp.bfloat16), b1,
                       w2.astype(jnp.bfloat16), b2,
                       mode="reduce", tm=8, th=128))
    assert jnp.allclose(out_bf.astype(jnp.float32), ref,
                        atol=8e-2, rtol=8e-2), "bf16 mismatch"

    print("KERNEL_OK")
</pallas_src>

<mosaic_0001>
module attributes {stable_mosaic.version = 11 : i64} {
  func.func @_expert_fused_kernel(%arg0: i32, %arg1: memref<8x128xf32, #tpu.memory_space<vmem>>, %arg2: memref<128x512xf32, #tpu.memory_space<vmem>>, %arg3: memref<1x512xf32, #tpu.memory_space<vmem>>, %arg4: memref<512x128xf32, #tpu.memory_space<vmem>>, %arg5: memref<1x128xf32, #tpu.memory_space<vmem>>, %arg6: memref<8x128xf32, #tpu.memory_space<vmem>>) attributes {dimension_semantics = [#tpu.dimension_semantics<parallel>], iteration_bounds = array<i64: 2>, scalar_prefetch = 0 : i64, scratch_operands = 0 : i64, tpu.core_type = #tpu.core_type<tc>, window_params = [{transform_indices = @transform_0, window_bounds = array<i64: 8, 128>}, {pipeline_mode = #tpu.pipeline_mode<synchronous>, transform_indices = @transform_1, window_bounds = array<i64: 128, 512>}, {pipeline_mode = #tpu.pipeline_mode<synchronous>, transform_indices = @transform_2, window_bounds = array<i64: 1, 512>}, {pipeline_mode = #tpu.pipeline_mode<synchronous>, transform_indices = @transform_3, window_bounds = array<i64: 512, 128>}, {pipeline_mode = #tpu.pipeline_mode<synchronous>, transform_indices = @transform_4, window_bounds = array<i64: 1, 128>}, {transform_indices = @transform_5, window_bounds = array<i64: 8, 128>}]} {
    %c0 = arith.constant 0 : index
    %c0_0 = arith.constant 0 : index
    %0 = vector.load %arg1[%c0, %c0_0] : memref<8x128xf32, #tpu.memory_space<vmem>>, vector<8x128xf32>
    %c0_1 = arith.constant 0 : index
    %c0_2 = arith.constant 0 : index
    %1 = vector.load %arg2[%c0_1, %c0_2] : memref<128x512xf32, #tpu.memory_space<vmem>>, vector<128x512xf32>
    %cst = arith.constant dense<0.000000e+00> : vector<8x512xf32>
    %2 = tpu.matmul %0, %1, %cst {dimension_numbers = #tpu.dot_dimension_numbers<[1], [0], [0], [1], [0, 0, 1, 1], [], []>} : vector<8x128xf32>, vector<128x512xf32>, vector<8x512xf32> -> vector<8x512xf32>
    %c0_3 = arith.constant 0 : index
    %c0_4 = arith.constant 0 : index
    %3 = vector.load %arg3[%c0_3, %c0_4] : memref<1x512xf32, #tpu.memory_space<vmem>>, vector<1x512xf32>
    %4 = vector.broadcast %3 : vector<1x512xf32> to vector<8x512xf32>
    %5 = arith.addf %2, %4 : vector<8x512xf32>
    %6 = arith.negf %5 : vector<8x512xf32>
    %7 = math.exp %6 : vector<8x512xf32>
    %cst_5 = arith.constant 1.000000e+00 : f32
    %8 = vector.broadcast %cst_5 : f32 to vector<8x512xf32>
    %9 = arith.addf %8, %7 : vector<8x512xf32>
    %10 = arith.divf %8, %9 : vector<8x512xf32>
    %11 = arith.mulf %5, %10 : vector<8x512xf32>
    %c0_6 = arith.constant 0 : index
    %c0_7 = arith.constant 0 : index
    %12 = vector.load %arg4[%c0_6, %c0_7] : memref<512x128xf32, #tpu.memory_space<vmem>>, vector<512x128xf32>
    %cst_8 = arith.constant dense<0.000000e+00> : vector<8x128xf32>
    %13 = tpu.matmul %11, %12, %cst_8 {dimension_numbers = #tpu.dot_dimension_numbers<[1], [0], [0], [1], [0, 0, 1, 1], [], []>} : vector<8x512xf32>, vector<512x128xf32>, vector<8x128xf32> -> vector<8x128xf32>
    %c0_9 = arith.constant 0 : index
    %c0_10 = arith.constant 0 : index
    %14 = vector.load %arg5[%c0_9, %c0_10] : memref<1x128xf32, #tpu.memory_space<vmem>>, vector<1x128xf32>
    %15 = vector.broadcast %14 : vector<1x128xf32> to vector<8x128xf32>
    %16 = arith.addf %13, %15 : vector<8x128xf32>
    %c0_11 = arith.constant 0 : index
    %c0_12 = arith.constant 0 : index
    %17 = vector.load %arg6[%c0_11, %c0_12] : memref<8x128xf32, #tpu.memory_space<vmem>>, vector<8x128xf32>
    tpu.vector_store %arg6[%c0_11, %c0_12], %16 {strides = array<i32>} : memref<8x128xf32, #tpu.memory_space<vmem>>, vector<8x128xf32>,
    return
  }
  func.func @transform_0(%arg0: i32) -> (i32, i32) {
    %c0_i32 = arith.constant 0 : i32
    %c0_i32_0 = arith.constant 0 : i32
    return %arg0, %c0_i32 : i32, i32
  }
  func.func @transform_1(%arg0: i32) -> (i32, i32) {
    %c0_i32 = arith.constant 0 : i32
    %c0_i32_0 = arith.constant 0 : i32
    %c0_i32_1 = arith.constant 0 : i32
    return %c0_i32, %c0_i32_0 : i32, i32
  }
  func.func @transform_2(%arg0: i32) -> (i32, i32) {
    %c0_i32 = arith.constant 0 : i32
    %c0_i32_0 = arith.constant 0 : i32
    %c0_i32_1 = arith.constant 0 : i32
    return %c0_i32, %c0_i32_0 : i32, i32
  }
  func.func @transform_3(%arg0: i32) -> (i32, i32) {
    %c0_i32 = arith.constant 0 : i32
    %c0_i32_0 = arith.constant 0 : i32
    %c0_i32_1 = arith.constant 0 : i32
    return %c0_i32, %c0_i32_0 : i32, i32
  }
  func.func @transform_4(%arg0: i32) -> (i32, i32) {
    %c0_i32 = arith.constant 0 : i32
    %c0_i32_0 = arith.constant 0 : i32
    %c0_i32_1 = arith.constant 0 : i32
    return %c0_i32, %c0_i32_0 : i32, i32
  }
  func.func @transform_5(%arg0: i32) -> (i32, i32) {
    %c0_i32 = arith.constant 0 : i32
    %c0_i32_0 = arith.constant 0 : i32
    return %arg0, %c0_i32 : i32, i32
  }
}

</mosaic_0001>

<bundles_post_ra>
// kernel: tpu_custom_call.1
= control target key start
LH: loop header
LB: loop body
LE: loop exit
PB: predicated region body
PF: predicated region fallthrough
CT: control target
= control target key end

     0   :  { %10 = vsyncpa [#allocation3], 0  ;;  %s1330_s0 = inlined_call_operand.hbm [shape: f32[16,128], index: 0, kind: input, shape index: {}]   ;;  %s1331_s1 = inlined_call_operand.hbm [shape: f32[128,512], index: 1, kind: input, shape index: {}]   ;;  %s1332_s2 = inlined_call_operand.hbm [shape: f32[1,512], index: 2, kind: input, shape index: {}]   ;;  %s1333_s3 = inlined_call_operand.hbm [shape: f32[512,128], index: 3, kind: input, shape index: {}]   ;;  %s1334_s4 = inlined_call_operand.vmem [shape: f32[1,128], index: 4, kind: input, shape index: {}]   ;;  %s1335_s5 = inlined_call_operand.hbm [shape: f32[16,128], index: 5, kind: output, shape index: {}]  }
   0x1   :  { %12 = vsyncpa [#allocation3 + $0x1], 0 }
   0x2   :  { %13 = vsyncpa [#allocation6], 0 }
   0x3   :  { %14 = vsyncpa [#allocation9], 0 }
   0x4   :  { %15 = vsyncpa [#allocation4], 0 }
   0x5   :  { %17 = vsyncpa [#allocation4 + $0x1], 0  ;;  %s1142_s18 = smov 0   ;;  %s1144_s19 = smov 0  }
   0x6   :  { %s1146_s20 = smov 0   ;;  %s1148_s21 = smov 0  }
   0x7 LB: > { %s175_s24 = sshll.u32 %s1331_s1, 4  ;;  %s1166_s25 = sadd.s32 4294967295, %s1103_s21   ;;  %s1103_s21 = sphi %s1148_s21, %s1346_s21   ;;  %s1099_s20 = sphi %s1146_s20, %s1345_s20   ;;  %s1095_s19 = sphi %s1144_s19, %s1344_s19   ;;  %s1091_s18 = sphi %s1142_s18, %s1343_s18   ;;  %s176_s24 = int_to_ptr.hbm [resolvable:$true] %s175_s24 }
   0x8   : > { %p790_p0 = scmp.ge.s32.totalorder %s1103_s21, 1  ;;  %p44_p1 = scmp.eq.s32.totalorder %s1166_s25, 0 }
   0x9   : > { %p164_p2 = scmp.lt.s32.totalorder %s1103_s21, 3  ;;  %s1105_s27 = smov [#allocation5]  }
   0xa   : > { %s177_s28 = sshll.u32 %s1105_s27, 4  ;;  %s190_s6 = sshll.u32 %s1332_s2, 4  ;;  %s178_s28 = int_to_ptr.vmem [resolvable:$true] %s177_s28  ;;  %s191_s6 = int_to_ptr.hbm [resolvable:$true] %s190_s6 }
   0xb   : > { %p1171_p3 = pnand %p790_p0, %p164_p2  ;;  %s201_s10 = sshll.u32 %s1333_s3, 4  ;;  %s202_s10 = int_to_ptr.hbm [resolvable:$true] %s201_s10 }
   0xc   : > { %s1106_s11 = smov [#allocation7]   ;;  %s1107_s13 = smov 512  }
   0xd   : > { %p827_p4 = pneg %p1171_p3  ;;  %s192_s12 = sshll.u32 %s1106_s11, 4  ;;  %s193_s12 = int_to_ptr.vmem [resolvable:$true] %s192_s12 }
   0xe   : > { %s1108_s14 = smov 32   ;;  %s1109_s15 = smov [#allocation8]  }
   0xf   : > { %p1183_p6 = pnand %p827_p4, %p44_p1  ;;  %s203_s16 = sshll.u32 %s1109_s15, 4  ;;  %s204_s16 = int_to_ptr.vmem [resolvable:$true] %s203_s16 }
  0x10   : > { %s1110_s17 = smov 128   ;;  %s1111_s22 = smov 8  }
  0x11   : > { %830 = dma.hbm_to_vmem [thread:$0]  (!%p1183_p6), %s176_s24, 8192, %s178_s28, [#allocation6], %s1107_s13, %s1107_s13, %s1108_s14  }
  0x12   : > { %833 = dma.hbm_to_vmem [thread:$0]  (!%p1183_p6), %s191_s6, 64, %s193_s12, [#allocation6]  }
  0x13   : > { %836 = dma.hbm_to_vmem [thread:$0]  (!%p1183_p6), %s202_s10, 8192, %s204_s16, [#allocation9], %s1110_s17, %s1110_s17, %s1111_s22  }
  0x14   : > { %s789_s23 = sadd.s32 4294967294, %s1103_s21   ;;  %s1198_s24 = sadd.s32 1, %s1103_s21  }
  0x15   : > { %s30_s27 = sadd.s32 1, %s1099_s20  ;;  %s27_s28 = ssub.s32 %s1103_s21, %s1198_s24 }
  0x16   : > { %p37_p7 = scmp.ne.s32.totalorder %s1099_s20, %s1095_s19  ;;  %p28_p8 = scmp.eq.s32.totalorder %s27_s28, 0 }
  0x17   : > { %p38_p9 = scmp.eq.s32.totalorder %s1103_s21, 0  ;;  %p43_p10 = scmp.ne.s32.totalorder %s1095_s19, %s1091_s18 }
  0x18   : > { %p151_p11 = scmp.eq.s32.totalorder %s1166_s25, 1  ;;  %p157_p0 = scmp.eq.s32.totalorder %s789_s23, 1 }
  0x19   : > { %s1210_s29 = scalar_select %p28_p8, %s1099_s20, %s30_s27  }
  0x1a   : > { %p1214_p12 = por %p44_p1, %p43_p10  ;;  %p1218_p13 = por %p151_p11, %p37_p7 }
  0x1b   : > { %p39_p2 = por %p38_p9, %p37_p7  ;;  %s220_s7 = sand.u32 1, %s1099_s20  }
  0x1c   : > { %p1223_p4 = por %p157_p0, %p43_p10  ;;  %p848_p6 = scmp.lt.s32.totalorder %s1103_s21, 2 }
  0x1d   : > { %s795_s9 = sshll.u32 %s220_s7, 3  ;;  %s796_s10 = sshll.u32 %s1103_s21, 3 }
  0x1e   : > { %s228_s13 = scalar_lea.hbm %s1330_s0, %s796_s10  ;;  %s224_s15 = scalar_lea.vmem [#allocation2], %s795_s9 }
  0x1f   : > { %s230_s14 = sshll.u32 %s228_s13, 4  ;;  %s232_s16 = sshll.u32 %s224_s15, 4  ;;  %s231_s14 = int_to_ptr.hbm [resolvable:$true] %s230_s14  ;;  %s233_s16 = int_to_ptr.vmem [resolvable:$true] %s232_s16 }
  0x20   : > { %p1232_p8 = pnand %p848_p6, %p39_p2  ;;  %s221_s22 = scalar_lea.sflag [#allocation3], %s220_s7 }
  0x21   : > { %s999_s23 = sshra.s32 %s231_s14, 4  ;;  %s1006_s9 = scalar_lea.hbm %s1330_s0, 16  ;;  %s1000_s23 = int_to_ptr.hbm [resolvable:$true] %s999_s23 }
  0x22   : > { %s1001_s27 = scalar_lea.hbm %s1000_s23, 8  ;;  %p1003_p9 = pneg %p1232_p8 }
  0x23   : > { %p1002_p7 = scmp.ne.s32.totalorder %s1000_s23, %s1001_s27  ;;  %p1007_p0 = scmp.lt.s32.totalorder %s1000_s23, %s1330_s0 }
  0x24   : > { %p1008_p2 = scmp.lt.s32.totalorder %s1006_s9, %s1001_s27 }
  0x25   : > { %p1004_p10 = pnand %p1003_p9, %p1002_p7 }
  0x26   : > { %p1009_p6 = por %p1008_p2, %p1007_p0 }
  0x27   : > { %p1005_p11 = pneg %p1004_p10 }
  0x29   : > { %p1010_p5 = pnand %p1009_p6, %p1005_p11 }
  0x2b   : > { %1013 = shalt.err (!%p1010_p5)
}
  0x2c   : > { %840 = dma.hbm_to_vmem [thread:$0]  (!%p1232_p8), %s231_s14, 128, %s233_s16, %s221_s22  }
  0x2d   : > { %241 = sbr.rel (%p1171_p3) target bundleno = 392 (0x188), region = 40  ;;  %s1249_s7 = sand.u32 (!%p1171_p3), 1, %s1095_s19  }
  0x2e   : > { %s798_s13 = sshll.u32 (!%p1171_p3), %s1249_s7, 3  ;;  %s244_s15 = scalar_lea.sflag (!%p1171_p3), [#allocation3], %s1249_s7 }
  0x2f   : > { %s1255_s23 = scalar_lea.vmem (!%p1171_p3), [#allocation2], %s798_s13 }
  0x32   : > { %1074 = dma.done.wait (%p1214_p12), %s244_s15, 128  }
  0x33   : > { %1076 = vsyncadd (%p1214_p12), %s244_s15, 4294967168 }
  0x34   : > { %1078 = dma.done.wait (%p44_p1), [#allocation6], 8256  }
  0x35   : > { %1080 = vsyncadd (%p44_p1), [#allocation6], 4294959040 }
  0x36   : > { %1082 = dma.done.wait (%p44_p1), [#allocation9], 8192  }
  0x37   : > { %1084 = vsyncadd (%p44_p1), [#allocation9], 4294959104  ;;  %v351_v0 = vld [vmem:[#allocation5 + $0x1e0] sm:$0xff]  ;;  %v352_v1 = vld [vmem:[#allocation5 + $0x1e8] sm:$0xff]  ;;  %s808_s14 = sshll.u32 %s1166_s25, 3  ;;  %s289_s27 = scalar_lea.vmem [#allocation10], %s798_s13 }
  0x38   : > { %v353_v2 = vld [vmem:[#allocation5 + $0x1f0] sm:$0xff]  ;;  %365 = vmatpush.msra.mxu0 %v351_v0  ;;  %385 = vmatpush.msra.mxu1 %v352_v1  ;;  %v354_v3 = vld [vmem:[#allocation5 + $0x1f8] sm:$0xff]  ;;  %v347_v4 = vld [vmem:[#allocation5 + $0x1c0] sm:$0xff]  ;;  %s685_s22 = scalar_lea.hbm %s1335_s5, %s808_s14  ;;  %s687_s28 = sshll.u32 %s289_s27, 4  ;;  %s688_s28 = int_to_ptr.vmem [resolvable:$true] %s687_s28 }
  0x39   : > { %v348_v5 = vld [vmem:[#allocation5 + $0x1c8] sm:$0xff]  ;;  %405 = vmatpush.msra.mxu2 %v353_v2  ;;  %425 = vmatpush.msra.mxu3 %v354_v3  ;;  %v349_v6 = vld [vmem:[#allocation5 + $0x1d0] sm:$0xff]  ;;  %v350_v7 = vld [vmem:[#allocation5 + $0x1d8] sm:$0xff]  ;;  %s689_s10 = sshll.u32 %s685_s22, 4  ;;  %s675_s25 = scalar_lea.sflag [#allocation4], %s1249_s7  ;;  %s690_s10 = int_to_ptr.hbm [resolvable:$true] %s689_s10 }
  0x3a   : > { %v343_v8 = vld [vmem:[#allocation5 + $0x1a0] sm:$0xff]  ;;  %366 = vmatpush.msra.mxu0 %v347_v4  ;;  %386 = vmatpush.msra.mxu1 %v348_v5  ;;  %v344_v9 = vld [vmem:[#allocation5 + $0x1a8] sm:$0xff]  ;;  %v345_v10 = vld [vmem:[#allocation5 + $0x1b0] sm:$0xff]  ;;  %s1043_s9 = sshra.s32 %s690_s10, 4  ;;  %s1049_s13 = scalar_lea.hbm %s1335_s5, 16  ;;  %s1044_s9 = int_to_ptr.hbm [resolvable:$true] %s1043_s9 }
  0x3b   : > { %v346_v11 = vld [vmem:[#allocation5 + $0x1b8] sm:$0xff]  ;;  %406 = vmatpush.msra.mxu2 %v349_v6  ;;  %426 = vmatpush.msra.mxu3 %v350_v7  ;;  %v339_v12 = vld [vmem:[#allocation5 + $0x180] sm:$0xff]  ;;  %v340_v13 = vld [vmem:[#allocation5 + $0x188] sm:$0xff]  ;;  %s1045_s11 = scalar_lea.hbm %s1044_s9, 8  ;;  %p1050_p12 = scmp.lt.s32.totalorder %s1044_s9, %s1335_s5 }
  0x3c   : > { %367 = vmatpush.msra.mxu0 %v343_v8  ;;  %387 = vmatpush.msra.mxu1 %v344_v9  ;;  %v341_v14 = vld [vmem:[#allocation5 + $0x190] sm:$0xff]  ;;  %v342_v15 = vld [vmem:[#allocation5 + $0x198] sm:$0xff]  ;;  %v335_v16 = vld [vmem:[#allocation5 + $0x160] sm:$0xff]  ;;  %p1046_p1 = scmp.ne.s32.totalorder %s1044_s9, %s1045_s11  ;;  %p1051_p8 = scmp.lt.s32.totalorder %s1049_s13, %s1045_s11 }
  0x3d   : > { %407 = vmatpush.msra.mxu2 %v345_v10  ;;  %427 = vmatpush.msra.mxu3 %v346_v11  ;;  %v336_v17 = vld [vmem:[#allocation5 + $0x168] sm:$0xff]  ;;  %v337_v18 = vld [vmem:[#allocation5 + $0x170] sm:$0xff]  ;;  %v338_v19 = vld [vmem:[#allocation5 + $0x178] sm:$0xff] }
  0x3e   : > { %368 = vmatpush.msra.mxu0 %v339_v12  ;;  %388 = vmatpush.msra.mxu1 %v340_v13  ;;  %v331_v20 = vld [vmem:[#allocation5 + $0x140] sm:$0xff]  ;;  %v332_v21 = vld [vmem:[#allocation5 + $0x148] sm:$0xff]  ;;  %v333_v22 = vld [vmem:[#allocation5 + $0x150] sm:$0xff]  ;;  %p1047_p3 = pnand %p1046_p1, %p1218_p13  ;;  %p1052_p7 = por %p1051_p8, %p1050_p12 }
  0x3f   : > { %408 = vmatpush.msra.mxu2 %v341_v14  ;;  %428 = vmatpush.msra.mxu3 %v342_v15  ;;  %v334_v23 = vld [vmem:[#allocation5 + $0x158] sm:$0xff]  ;;  %v327_v24 = vld [vmem:[#allocation5 + $0x120] sm:$0xff]  ;;  %v328_v25 = vld [vmem:[#allocation5 + $0x128] sm:$0xff] }
  0x40   : > { %369 = vmatpush.msra.mxu0 %v335_v16  ;;  %389 = vmatpush.msra.mxu1 %v336_v17  ;;  %v329_v26 = vld [vmem:[#allocation5 + $0x130] sm:$0xff]  ;;  %v330_v27 = vld [vmem:[#allocation5 + $0x138] sm:$0xff]  ;;  %v323_v28 = vld [vmem:[#allocation5 + $0x100] sm:$0xff]  ;;  %p1048_p5 = pneg %p1047_p3 }
  0x41   : > { %409 = vmatpush.msra.mxu2 %v337_v18  ;;  %429 = vmatpush.msra.mxu3 %v338_v19  ;;  %v324_v29 = vld [vmem:[#allocation5 + $0x108] sm:$0xff]  ;;  %v325_v30 = vld [vmem:[#allocation5 + $0x110] sm:$0xff]  ;;  %v326_v31 = vld [vmem:[#allocation5 + $0x118] sm:$0xff] }
  0x42   : > { %370 = vmatpush.msra.mxu0 %v331_v20  ;;  %390 = vmatpush.msra.mxu1 %v332_v21  ;;  %v319_v32 = vld [vmem:[#allocation5 + $0xe0] sm:$0xff]  ;;  %v320_v33 = vld [vmem:[#allocation5 + $0xe8] sm:$0xff]  ;;  %v321_v34 = vld [vmem:[#allocation5 + $0xf0] sm:$0xff]  ;;  %p1053_p9 = pnand %p1052_p7, %p1048_p5 }
  0x43   : > { %410 = vmatpush.msra.mxu2 %v333_v22  ;;  %430 = vmatpush.msra.mxu3 %v334_v23  ;;  %v322_v35 = vld [vmem:[#allocation5 + $0xf8] sm:$0xff]  ;;  %v315_v36 = vld [vmem:[#allocation5 + $0xc0] sm:$0xff]  ;;  %v316_v37 = vld [vmem:[#allocation5 + $0xc8] sm:$0xff] }
  0x44   : > { %371 = vmatpush.msra.mxu0 %v327_v24  ;;  %391 = vmatpush.msra.mxu1 %v328_v25  ;;  %v317_v38 = vld [vmem:[#allocation5 + $0xd0] sm:$0xff]  ;;  %v318_v39 = vld [vmem:[#allocation5 + $0xd8] sm:$0xff]  ;;  %v311_v40 = vld [vmem:[#allocation5 + $0xa0] sm:$0xff] }
  0x45   : > { %411 = vmatpush.msra.mxu2 %v329_v26  ;;  %431 = vmatpush.msra.mxu3 %v330_v27  ;;  %v312_v41 = vld [vmem:[#allocation5 + $0xa8] sm:$0xff]  ;;  %v313_v42 = vld [vmem:[#allocation5 + $0xb0] sm:$0xff]  ;;  %v314_v43 = vld [vmem:[#allocation5 + $0xb8] sm:$0xff] }
  0x46   : > { %372 = vmatpush.msra.mxu0 %v323_v28  ;;  %392 = vmatpush.msra.mxu1 %v324_v29  ;;  %v307_v44 = vld [vmem:[#allocation5 + $0x80] sm:$0xff]  ;;  %v308_v45 = vld [vmem:[#allocation5 + $0x88] sm:$0xff]  ;;  %v309_v46 = vld [vmem:[#allocation5 + $0x90] sm:$0xff] }
  0x47   : > { %412 = vmatpush.msra.mxu2 %v325_v30  ;;  %432 = vmatpush.msra.mxu3 %v326_v31  ;;  %v310_v47 = vld [vmem:[#allocation5 + $0x98] sm:$0xff]  ;;  %v303_v48 = vld [vmem:[#allocation5 + $0x60] sm:$0xff]  ;;  %v304_v49 = vld [vmem:[#allocation5 + $0x68] sm:$0xff] }
  0x48   : > { %373 = vmatpush.msra.mxu0 %v319_v32  ;;  %393 = vmatpush.msra.mxu1 %v320_v33  ;;  %v305_v50 = vld [vmem:[#allocation5 + $0x70] sm:$0xff]  ;;  %v306_v51 = vld [vmem:[#allocation5 + $0x78] sm:$0xff]  ;;  %v299_v52 = vld [vmem:[#allocation5 + $0x40] sm:$0xff] }
  0x49   : > { %413 = vmatpush.msra.mxu2 %v321_v34  ;;  %433 = vmatpush.msra.mxu3 %v322_v35  ;;  %v300_v53 = vld [vmem:[#allocation5 + $0x48] sm:$0xff]  ;;  %v301_v54 = vld [vmem:[#allocation5 + $0x50] sm:$0xff]  ;;  %v302_v55 = vld [vmem:[#allocation5 + $0x58] sm:$0xff] }
  0x4a   : > { %374 = vmatpush.msra.mxu0 %v315_v36  ;;  %394 = vmatpush.msra.mxu1 %v316_v37  ;;  %v295_v56 = vld [vmem:[#allocation5 + $0x20] sm:$0xff]  ;;  %v296_v57 = vld [vmem:[#allocation5 + $0x28] sm:$0xff]  ;;  %v297_v58 = vld [vmem:[#allocation5 + $0x30] sm:$0xff] }
  0x4b   : > { %414 = vmatpush.msra.mxu2 %v317_v38  ;;  %434 = vmatpush.msra.mxu3 %v318_v39  ;;  %v298_v59 = vld [vmem:[#allocation5 + $0x38] sm:$0xff]  ;;  %v291_v60 = vld [vmem:[#allocation5] sm:$0xff]  ;;  %v292_v61 = vld [vmem:[#allocation5 + $0x8] sm:$0xff] }
  0x4c   : > { %375 = vmatpush.msra.mxu0 %v311_v40  ;;  %395 = vmatpush.msra.mxu1 %v312_v41  ;;  %v293_v62 = vld [vmem:[#allocation5 + $0x10] sm:$0xff]  ;;  %v294_v63 = vld [vmem:[#allocation5 + $0x18] sm:$0xff]  ;;  %v537_v7 = vld [vmem:[#allocation8 + $0x60] sm:$0xff] }
  0x4d   : > { %415 = vmatpush.msra.mxu2 %v313_v42  ;;  %435 = vmatpush.msra.mxu3 %v314_v43  ;;  %v290_v0 = vld [vmem:[%s1255_s23] sm:$0xff]  ;;  %v553_v8 = vld [vmem:[#allocation8 + $0xe0] sm:$0xff]  ;;  %v1270_v38 = vld [vmem:[#allocation7] sm:$0xf] }
  0x4e   : > { %376 = vmatpush.msra.mxu0 %v307_v44  ;;  %396 = vmatpush.msra.mxu1 %v308_v45  ;;  %v540_v1 = vld [vmem:[#allocation8 + $0x78] sm:$0xff]  ;;  %v539_v3 = vld [vmem:[#allocation8 + $0x70] sm:$0xff]  ;;  %v538_v5 = vld [vmem:[#allocation8 + $0x68] sm:$0xff]  ;;  %v357_v44 = vperm.slane %v1270_v38, 0  ;;  %v358_v45 = vperm.slane %v1270_v38, 1 }
  0x4f   : > { %416 = vmatpush.msra.mxu2 %v309_v46  ;;  %436 = vmatpush.msra.mxu3 %v310_v47  ;;  %v556_v2 = vld [vmem:[#allocation8 + $0xf8] sm:$0xff]  ;;  %v555_v4 = vld [vmem:[#allocation8 + $0xf0] sm:$0xff]  ;;  %v554_v6 = vld [vmem:[#allocation8 + $0xe8] sm:$0xff] }
  0x50   : > { %377 = vmatpush.msra.mxu0 %v303_v48  ;;  %397 = vmatpush.msra.mxu1 %v304_v49  ;;  %v572_v9 = vld [vmem:[#allocation8 + $0x178] sm:$0xff]  ;;  %v571_v13 = vld [vmem:[#allocation8 + $0x170] sm:$0xff]  ;;  %v570_v17 = vld [vmem:[#allocation8 + $0x168] sm:$0xff] }
  0x51   : > { %417 = vmatpush.msra.mxu2 %v305_v50  ;;  %437 = vmatpush.msra.mxu3 %v306_v51  ;;  %v588_v10 = vld [vmem:[#allocation8 + $0x1f8] sm:$0xff]  ;;  %v587_v14 = vld [vmem:[#allocation8 + $0x1f0] sm:$0xff]  ;;  %v586_v18 = vld [vmem:[#allocation8 + $0x1e8] sm:$0xff] }
  0x52   : > { %378 = vmatpush.msra.mxu0 %v299_v52  ;;  %398 = vmatpush.msra.mxu1 %v300_v53  ;;  %v536_v11 = vld [vmem:[#allocation8 + $0x58] sm:$0xff]  ;;  %v535_v15 = vld [vmem:[#allocation8 + $0x50] sm:$0xff]  ;;  %v534_v19 = vld [vmem:[#allocation8 + $0x48] sm:$0xff] }
  0x53   : > { %418 = vmatpush.msra.mxu2 %v301_v54  ;;  %438 = vmatpush.msra.mxu3 %v302_v55  ;;  %v552_v12 = vld [vmem:[#allocation8 + $0xd8] sm:$0xff]  ;;  %v551_v16 = vld [vmem:[#allocation8 + $0xd0] sm:$0xff]  ;;  %v550_v20 = vld [vmem:[#allocation8 + $0xc8] sm:$0xff] }
  0x54   : > { %379 = vmatpush.msra.mxu0 %v295_v56  ;;  %399 = vmatpush.msra.mxu1 %v296_v57  ;;  %v569_v21 = vld [vmem:[#allocation8 + $0x160] sm:$0xff]  ;;  %v568_v25 = vld [vmem:[#allocation8 + $0x158] sm:$0xff]  ;;  %v567_v29 = vld [vmem:[#allocation8 + $0x150] sm:$0xff] }
  0x55   : > { %419 = vmatpush.msra.mxu2 %v297_v58  ;;  %439 = vmatpush.msra.mxu3 %v298_v59  ;;  %v585_v22 = vld [vmem:[#allocation8 + $0x1e0] sm:$0xff]  ;;  %v584_v26 = vld [vmem:[#allocation8 + $0x1d8] sm:$0xff]  ;;  %v583_v30 = vld [vmem:[#allocation8 + $0x1d0] sm:$0xff] }
  0x56   : > { %380 = vmatpush.msra.mxu0 %v291_v60  ;;  %400 = vmatpush.msra.mxu1 %v292_v61  ;;  %v533_v23 = vld [vmem:[#allocation8 + $0x40] sm:$0xff]  ;;  %v532_v27 = vld [vmem:[#allocation8 + $0x38] sm:$0xff]  ;;  %v531_v31 = vld [vmem:[#allocation8 + $0x30] sm:$0xff] }
  0x57   : > { %420 = vmatpush.msra.mxu2 %v293_v62  ;;  %440 = vmatpush.msra.mxu3 %v294_v63  ;;  %v549_v24 = vld [vmem:[#allocation8 + $0xc0] sm:$0xff]  ;;  %v548_v28 = vld [vmem:[#allocation8 + $0xb8] sm:$0xff]  ;;  %v547_v32 = vld [vmem:[#allocation8 + $0xb0] sm:$0xff] }
  0x58   : > { %381 = vmatmul.f32.vlgmr.msra.gmra.mxu0 %v290_v0  ;;  %401 = vmatmul.f32.vlgmr.msra.gmra.mxu1 %v290_v0  ;;  %v566_v33 = vld [vmem:[#allocation8 + $0x148] sm:$0xff]  ;;  %v565_v37 = vld [vmem:[#allocation8 + $0x140] sm:$0xff]  ;;  %v564_v42 = vld [vmem:[#allocation8 + $0x138] sm:$0xff] }
  0x59   : > { %421 = vmatmul.f32.vlgmr.msra.gmra.mxu2 %v290_v0  ;;  %441 = vmatmul.f32.vlgmr.msra.gmra.mxu3 %v290_v0  ;;  %v582_v34 = vld [vmem:[#allocation8 + $0x1c8] sm:$0xff]  ;;  %v581_v39 = vld [vmem:[#allocation8 + $0x1c0] sm:$0xff]  ;;  %v580_v43 = vld [vmem:[#allocation8 + $0x1b8] sm:$0xff] }
  0x5a   : > { %593 = vmatpush.msrb.mxu0 %v540_v1  ;;  %613 = vmatpush.msrb.mxu1 %v556_v2  ;;  %v530_v35 = vld [vmem:[#allocation8 + $0x28] sm:$0xff]  ;;  %v529_v40 = vld [vmem:[#allocation8 + $0x20] sm:$0xff]  ;;  %v528_v46 = vld [vmem:[#allocation8 + $0x18] sm:$0xff]  ;;  %v359_v2 = vperm.slane %v1270_v38, 2 }
  0x5b   : > { %633 = vmatpush.msrb.mxu2 %v572_v9  ;;  %653 = vmatpush.msrb.mxu3 %v588_v10  ;;  %v546_v36 = vld [vmem:[#allocation8 + $0xa8] sm:$0xff]  ;;  %v545_v41 = vld [vmem:[#allocation8 + $0xa0] sm:$0xff]  ;;  %v544_v47 = vld [vmem:[#allocation8 + $0x98] sm:$0xff] }
  0x5c   : > { %594 = vmatpush.msrb.mxu0 %v539_v3  ;;  %614 = vmatpush.msrb.mxu1 %v555_v4  ;;  %v563_v48 = vld [vmem:[#allocation8 + $0x130] sm:$0xff]  ;;  %v562_v52 = vld [vmem:[#allocation8 + $0x128] sm:$0xff]  ;;  %v561_v60 = vld [vmem:[#allocation8 + $0x120] sm:$0xff]  ;;  %v360_v3 = vperm.slane %v1270_v38, 3 }
  0x5d   : > { %634 = vmatpush.msrb.mxu2 %v571_v13  ;;  %654 = vmatpush.msrb.mxu3 %v587_v14  ;;  %v579_v49 = vld [vmem:[#allocation8 + $0x1b0] sm:$0xff]  ;;  %v578_v55 = vld [vmem:[#allocation8 + $0x1a8] sm:$0xff]  ;;  %v577_v61 = vld [vmem:[#allocation8 + $0x1a0] sm:$0xff] }
  0x5e   : > { %595 = vmatpush.msrb.mxu0 %v538_v5  ;;  %615 = vmatpush.msrb.mxu1 %v554_v6  ;;  %v527_v50 = vld [vmem:[#allocation8 + $0x10] sm:$0xff]  ;;  %v526_v58 = vld [vmem:[#allocation8 + $0x8] sm:$0xff]  ;;  %v525_v0 = vld [vmem:[#allocation8] sm:$0xff] }
  0x5f   : > { %635 = vmatpush.msrb.mxu2 %v570_v17  ;;  %655 = vmatpush.msrb.mxu3 %v586_v18  ;;  %v543_v51 = vld [vmem:[#allocation8 + $0x90] sm:$0xff]  ;;  %v542_v59 = vld [vmem:[#allocation8 + $0x88] sm:$0xff]  ;;  %v541_v1 = vld [vmem:[#allocation8 + $0x80] sm:$0xff] }
  0x60   : > { %596 = vmatpush.msrb.mxu0 %v537_v7  ;;  %616 = vmatpush.msrb.mxu1 %v553_v8  ;;  %v560_v4 = vld [vmem:[#allocation8 + $0x118] sm:$0xff]  ;;  %v559_v6 = vld [vmem:[#allocation8 + $0x110] sm:$0xff]  ;;  %v558_v10 = vld [vmem:[#allocation8 + $0x108] sm:$0xff] }
  0x61   : > { %636 = vmatpush.msrb.mxu2 %v569_v21  ;;  %656 = vmatpush.msrb.mxu3 %v585_v22  ;;  %v576_v5 = vld [vmem:[#allocation8 + $0x198] sm:$0xff]  ;;  %v575_v7 = vld [vmem:[#allocation8 + $0x190] sm:$0xff]  ;;  %v557_v14 = vld [vmem:[#allocation8 + $0x100] sm:$0xff] }
  0x62   : > { %597 = vmatpush.msrb.mxu0 %v536_v11  ;;  %617 = vmatpush.msrb.mxu1 %v552_v12  ;;  %v574_v11 = vld [vmem:[#allocation8 + $0x188] sm:$0xff] }
  0x63   : > { %637 = vmatpush.msrb.mxu2 %v568_v25  ;;  %657 = vmatpush.msrb.mxu3 %v584_v26 }
  0x64   : > { %598 = vmatpush.msrb.mxu0 %v535_v15  ;;  %618 = vmatpush.msrb.mxu1 %v551_v16  ;;  %v573_v15 = vld [vmem:[#allocation8 + $0x180] sm:$0xff] }
  0x65   : > { %638 = vmatpush.msrb.mxu2 %v567_v29  ;;  %658 = vmatpush.msrb.mxu3 %v583_v30 }
  0x66   : > { %599 = vmatpush.msrb.mxu0 %v534_v19  ;;  %619 = vmatpush.msrb.mxu1 %v550_v20 }
  0x67   : > { %639 = vmatpush.msrb.mxu2 %v566_v33  ;;  %659 = vmatpush.msrb.mxu3 %v582_v34 }
  0x68   : > { %600 = vmatpush.msrb.mxu0 %v533_v23  ;;  %620 = vmatpush.msrb.mxu1 %v549_v24 }
  0x69   : > { %640 = vmatpush.msrb.mxu2 %v565_v37  ;;  %660 = vmatpush.msrb.mxu3 %v581_v39 }
  0x6a   : > { %601 = vmatpush.msrb.mxu0 %v532_v27  ;;  %621 = vmatpush.msrb.mxu1 %v548_v28 }
  0x6b   : > { %641 = vmatpush.msrb.mxu2 %v564_v42  ;;  %661 = vmatpush.msrb.mxu3 %v580_v43 }
  0x6c   : > { %602 = vmatpush.msrb.mxu0 %v531_v31  ;;  %622 = vmatpush.msrb.mxu1 %v547_v32 }
  0x6d   : > { %642 = vmatpush.msrb.mxu2 %v563_v48  ;;  %662 = vmatpush.msrb.mxu3 %v579_v49 }
  0x6e   : > { %603 = vmatpush.msrb.mxu0 %v530_v35  ;;  %623 = vmatpush.msrb.mxu1 %v546_v36 }
  0x6f   : > { %643 = vmatpush.msrb.mxu2 %v562_v52  ;;  %663 = vmatpush.msrb.mxu3 %v578_v55 }
  0x70   : > { %604 = vmatpush.msrb.mxu0 %v529_v40  ;;  %624 = vmatpush.msrb.mxu1 %v545_v41 }
  0x71   : > { %644 = vmatpush.msrb.mxu2 %v561_v60  ;;  %664 = vmatpush.msrb.mxu3 %v577_v61 }
  0x72   : > { %605 = vmatpush.msrb.mxu0 %v528_v46  ;;  %625 = vmatpush.msrb.mxu1 %v544_v47 }
  0x73   : > { %645 = vmatpush.msrb.mxu2 %v560_v4  ;;  %665 = vmatpush.msrb.mxu3 %v576_v5 }
  0x74   : > { %606 = vmatpush.msrb.mxu0 %v527_v50  ;;  %626 = vmatpush.msrb.mxu1 %v543_v51 }
  0x75   : > { %646 = vmatpush.msrb.mxu2 %v559_v6  ;;  %666 = vmatpush.msrb.mxu3 %v575_v7  ;;  %v892_v6 = vld [vmem:[%s1334_s4] ss:$0 sm:$0xff] }
  0x76   : > { %607 = vmatpush.msrb.mxu0 %v526_v58  ;;  %627 = vmatpush.msrb.mxu1 %v542_v59 }
  0x77   : > { %647 = vmatpush.msrb.mxu2 %v558_v10  ;;  %667 = vmatpush.msrb.mxu3 %v574_v11 }
  0x78   : > { %608 = vmatpush.msrb.mxu0 %v525_v0  ;;  %628 = vmatpush.msrb.mxu1 %v541_v1 }
  0x79   : > { %648 = vmatpush.msrb.mxu2 %v557_v14  ;;  %668 = vmatpush.msrb.mxu3 %v573_v15 }
  0xd5   : > { %v382_v53 = vpop.f32.mrf.mxu0  ;;  %v402_v54 = vpop.f32.mrf.mxu1 }
  0xd6   : > { %v1274_v56 = vadd.f32 %v382_v53, %v357_v44  ;;  %v1276_v57 = vadd.f32 %v402_v54, %v358_v45 }
  0xd8   : > { %v803_v62 = vmul.f32 -1.442695, %v1274_v56  ;;  %v804_v63 = vmul.f32 -1.442695, %v1276_v57 }
  0xda   : > { %893 = vpow2.f32 %v803_v62 }
  0xdb   : > { %895 = vpow2.f32 %v804_v63 }
  0xdc   : > { %v422_v8 = vpop.f32.mrf.mxu2  ;;  %v442_v9 = vpop.f32.mrf.mxu3 }
  0xdd   : > { %v1282_v12 = vadd.f32 %v422_v8, %v359_v2  ;;  %v1284_v13 = vadd.f32 %v442_v9, %v360_v3 }
  0xdf   : > { %v805_v16 = vmul.f32 -1.442695, %v1282_v12  ;;  %v806_v17 = vmul.f32 -1.442695, %v1284_v13 }
  0xe0   : > { %v894_v18 = vpop.eup %893 }
  0xe1   : > { %v896_v19 = vpop.eup %895  ;;  %v457_v20 = vadd.f32 1.0, %v894_v18  ;;  %897 = vpow2.f32 %v805_v16 }
  0xe2   : > { %v458_v21 = vadd.f32 1.0, %v896_v19  ;;  %899 = vpow2.f32 %v806_v17 }
  0xe3   : > { %901 = vrcp.f32 %v457_v20  ;;  %vm466_vm0 = vweird.f32 %v457_v20  ;;  %v470_v31 = vand.u32 2147483647, %v457_v20  ;;  %v472_v32 = vand.u32 2147483648, %v457_v20 }
  0xe4   : > { %903 = vrcp.f32 %v458_v21  ;;  %v485_v35 = vand.u32 2147483647, %v458_v21  ;;  %v487_v36 = vand.u32 2147483648, %v458_v21  ;;  %vm481_vm2 = vweird.f32 %v458_v21 }
  0xe5   : > { %v473_v40 = vor.u32 1.1754944e-38, %v472_v32  ;;  %vm471_vm5 = vcmp.eq.f32.partialorder %v470_v31, 8.507059e+37 }
  0xe6   : > { %vm486_vm7 = vcmp.eq.f32.partialorder %v485_v35, 8.507059e+37  ;;  %v488_v45 = vor.u32 1.1754944e-38, %v487_v36 }
  0xe7   : > { %v898_v22 = vpop.eup %897 }
  0xe8   : > { %v900_v23 = vpop.eup %899  ;;  %v459_v24 = vadd.f32 1.0, %v898_v22 }
  0xe9   : > { %v902_v25 = vpop.eup %901  ;;  %v460_v26 = vadd.f32 1.0, %v900_v23 }
  0xea   : > { %v904_v27 = vpop.eup %903  ;;  %v462_v28 = vmul.f32 %v902_v25, %v457_v20  ;;  %905 = vrcp.f32 %v459_v24  ;;  %vm467_vm1 = vweird.f32 %v902_v25  ;;  %v500_v52 = vand.u32 2147483647, %v459_v24 }
  0xeb   : > { %v477_v29 = vmul.f32 %v904_v27, %v458_v21  ;;  %907 = vrcp.f32 %v460_v26  ;;  %vm482_vm3 = vweird.f32 %v904_v27  ;;  %vm468_vm4 = vmor %vm466_vm0, %vm467_vm1  ;;  %v502_v53 = vand.u32 2147483648, %v459_v24 }
  0xec   : > { %v463_v30 = vsub.f32 1.0, %v462_v28  ;;  %vm483_vm6 = vmor %vm481_vm2, %vm482_vm3  ;;  %vm496_vm9 = vweird.f32 %v459_v24  ;;  %v517_v59 = vand.u32 2147483648, %v460_v26  ;;  %v515_v62 = vand.u32 2147483647, %v460_v26 }
  0xed   : > { %v478_v33 = vsub.f32 1.0, %v477_v29  ;;  %v503_v63 = vor.u32 1.1754944e-38, %v502_v53  ;;  %vm501_vm12 = vcmp.eq.f32.partialorder %v500_v52, 8.507059e+37  ;;  %vm511_vm13 = vweird.f32 %v460_v26 }
  0xee   : > { %v464_v34 = vmul.f32 %v902_v25, %v463_v30  ;;  %vm516_vm15 = vcmp.eq.f32.partialorder %v515_v62, 8.507059e+37 }
  0xef   : > { %v479_v37 = vmul.f32 %v904_v27, %v478_v33 }
  0xf0   : > { %v906_v38 = vpop.eup %905  ;;  %v465_v39 = vadd.f32 %v902_v25, %v464_v34 }
  0xf1   : > { %v480_v41 = vadd.f32 %v904_v27, %v479_v37  ;;  %v492_v42 = vmul.f32 %v906_v38, %v459_v24  ;;  %v908_v43 = vpop.eup %907  ;;  %vm497_vm8 = vweird.f32 %v906_v38 }
  0xf2   : > { %v469_v44 = vsel %vm468_vm4, %v902_v25, %v465_v39  ;;  %v507_v49 = vmul.f32 %v908_v43, %v460_v26  ;;  %vm512_vm10 = vweird.f32 %v908_v43  ;;  %vm498_vm11 = vmor %vm496_vm9, %vm497_vm8 }
  0xf3   : > { %v474_v46 = vsel %vm471_vm5, %v473_v40, %v469_v44  ;;  %v484_v47 = vsel %vm483_vm6, %v904_v27, %v480_v41  ;;  %v493_v48 = vsub.f32 1.0, %v492_v42  ;;  %vm513_vm14 = vmor %vm511_vm13, %vm512_vm10 }
  0xf4   : > { %v521_v50 = vmul.f32 %v474_v46, %v1274_v56  ;;  %v489_v51 = vsel %vm486_vm7, %v488_v45, %v484_v47  ;;  %v508_v58 = vsub.f32 1.0, %v507_v49 }
  0xf5   : > { %v522_v54 = vmul.f32 %v489_v51, %v1276_v57  ;;  %v494_v55 = vmul.f32 %v906_v38, %v493_v48  ;;  %v518_v57 = vor.u32 1.1754944e-38, %v517_v59 }
  0xf6   : > { %609 = vmatmul.f32.vlgmr.msrb.gmra.mxu0 %v521_v50  ;;  %v509_v61 = vmul.f32 %v908_v43, %v508_v58 }
  0xf7   : > { %v495_v60 = vadd.f32 %v906_v38, %v494_v55  ;;  %629 = vmatmul.f32.vlgmr.msrb.gmra.mxu1 %v522_v54 }
  0xf8   : > { %v510_v56 = vadd.f32 %v908_v43, %v509_v61 }
  0xf9   : > { %v499_v0 = vsel %vm498_vm11, %v906_v38, %v495_v60 }
  0xfa   : > { %v504_v1 = vsel %vm501_vm12, %v503_v63, %v499_v0  ;;  %v514_v3 = vsel %vm513_vm14, %v908_v43, %v510_v56 }
  0xfb   : > { %v523_v2 = vmul.f32 %v504_v1, %v1282_v12  ;;  %v519_v4 = vsel %vm516_vm15, %v518_v57, %v514_v3 }
  0xfc   : > { %v524_v5 = vmul.f32 %v519_v4, %v1284_v13 }
  0xfd   : > { %649 = vmatmul.f32.vlgmr.msrb.gmra.mxu2 %v523_v2 }
  0xfe   : > { %669 = vmatmul.f32.vlgmr.msrb.gmra.mxu3 %v524_v5 }
 0x173   : > { %v610_v7 = vpop.f32.mrf.mxu0 }
 0x174   : > { %v611_v8 = vadd.f32 %v892_v6, %v610_v7  ;;  %v630_v9 = vpop.f32.mrf.mxu1 }
 0x176   : > { %v631_v10 = vadd.f32 %v630_v9, %v611_v8 }
 0x180   : > { %v650_v11 = vpop.f32.mrf.mxu2 }
 0x181   : > { %v651_v12 = vadd.f32 %v650_v11, %v631_v10  ;;  %v670_v13 = vpop.f32.mrf.mxu3 }
 0x183   : > { %v671_v14 = vadd.f32 %v670_v13, %v651_v12 }
 0x185   : > { %673 = vst [vmem:[%s289_s27] sm:$0xff] %v671_v14 }
 0x186   : > { %1056 = shalt.err (!%p1053_p9)
}
 0x187   : > { %825 = dma.vmem_to_hbm [thread:$0]  (%p1218_p13), %s688_s28, 128, %s690_s10, %s675_s25  }
 0x188 PF: > { %s701_s7 = sand.u32 1, %s1091_s18   ;;  %p1342_p10 = scmp.ge.s32.totalorder %s1103_s21, 2 }
 0x189   : > { %s702_s30 = scalar_lea.sflag [#allocation4], %s701_s7 }
 0x18a   : > { %p842_p11 = pnand %p1342_p10, %p1223_p4 }
 0x18c   : > { %p843_p0 = pneg %p842_p11 }
 0x18e   : > { %1086 = dma.done.wait (%p843_p0), %s702_s30, 128  }
 0x18f   : > { %1088 = vsyncadd (%p843_p0), %s702_s30, 4294967168  ;;  %p20_p2 = scmp.ge.s32.totalorder %s1198_s24, 4   ;;  %s1343_s18 = smov %s1095_s19 }
 0x190   : > { %s1344_s19 = smov %s1099_s20  ;;  %s1345_s20 = smov %s1210_s29 }
 0x191   : > { %s1346_s21 = smov %s1198_s24  ;;  %22 = sbr.rel (!%p20_p2) target bundleno = 7 (0x7), region = 97 }
 0x196   :  { %708 = vsyncpa [#allocation3], 1 }
 0x197   :  { %710 = vsyncpa [#allocation3 + $0x1], 1 }
 0x198   :  { %711 = vsyncpa [#allocation6], 1 }
 0x199   :  { %712 = vsyncpa [#allocation9], 1 }
 0x19a   :  { %713 = vsyncpa [#allocation4], 1 }
 0x19b   :  { %715 = vsyncpa [#allocation4 + $0x1], 1 }

</bundles_post_ra>
